<compile_context>
chip_gen: v5e
topology: v5e:2x2
jax: 0.10.0
libtpu: 0.0.40
codegen_flags: <defaults>
</compile_context>

<pallas_src>
import math
import functools

import jax
import jax.numpy as jnp
from jax.experimental import pallas as pl
from jax.experimental.pallas import tpu as pltpu


def _cross_attn_kernel(x_ref, y_ref,
                       wq_ref, bq_ref, wk_ref, bk_ref, wv_ref, bv_ref,
                       wo_ref, bo_ref,
                       o_ref,
                       attn_scratch,
                       *, n_heads, d_head):
    # x_ref: (TILE_Q, d_embed)   y_ref: (Lkv, d_cross)   (batch dim squeezed out)
    in_dtype = x_ref.dtype
    scale = 1.0 / math.sqrt(d_head)

    x = x_ref[...]                      # keep native dtype for the MXU
    y = y_ref[...]

    # --- in-projections (fat MXU matmuls, f32 accumulation) ---
    q = jnp.dot(x, wq_ref[...], preferred_element_type=jnp.float32) + bq_ref[...]
    k = jnp.dot(y, wk_ref[...], preferred_element_type=jnp.float32) + bk_ref[...]
    v = jnp.dot(y, wv_ref[...], preferred_element_type=jnp.float32) + bv_ref[...]

    # fold the attention scale into q once (TQ x E), not into the (H, TQ, Lkv) scores
    q = q * scale

    # --- head-major (H, L, d_head) operands: heads land on a non-lane axis ---
    def split_heads(t):
        return jnp.stack(
            [t[:, h * d_head:(h + 1) * d_head] for h in range(n_heads)], axis=0
        ).astype(in_dtype)

    qh = split_heads(q)                 # (H, TQ,  dh)
    kh = split_heads(k)                 # (H, Lkv, dh)
    vh = split_heads(v)                 # (H, Lkv, dh)

    # --- batched scaled-dot-product attention (contract last dims; no kh.T) ---
    s = jnp.einsum('hqd,hkd->hqk', qh, kh,
                   preferred_element_type=jnp.float32)        # (H, TQ, Lkv)
    s = s - jnp.max(s, axis=-1, keepdims=True)
    p = jnp.exp(s)
    p = p * pl.reciprocal(jnp.sum(p, axis=-1, keepdims=True), approx=True)

    o = jnp.einsum('hqk,hkd->hqd', p.astype(in_dtype), vh,
                   preferred_element_type=jnp.float32)        # (H, TQ, dh)

    # write each head's output directly into the (TQ, d_embed) scratch slab (no concat)
    for h in range(n_heads):
        attn_scratch[:, h * d_head:(h + 1) * d_head] = o[h]

    # --- out projection ---
    out = jnp.dot(attn_scratch[...].astype(in_dtype), wo_ref[...],
                  preferred_element_type=jnp.float32) + bo_ref[...]
    o_ref[...] = out.astype(o_ref.dtype)


def _pick_tile_q(lq, cap=256):
    """Largest multiple-of-8 divisor of Lq that is <= cap (or full Lq if Lq <= cap)."""
    if lq <= cap:
        return lq
    for t in range(cap - cap % 8, 7, -8):
        if lq % t == 0:
            return t
    return lq


def cross_attention(x, y, params, *, n_heads):
    """x: (B, Lq, d_embed), y: (B, Lkv, d_cross).  params holds pre-transposed weights."""
    B, Lq, d_embed = x.shape
    _, Lkv, d_cross = y.shape
    d_head = d_embed // n_heads

    wq, bq, wk, bk, wv, bv, wo, bo = params

    tile_q = _pick_tile_q(Lq)
    n_q_tiles = Lq // tile_q

    kernel = functools.partial(_cross_attn_kernel, n_heads=n_heads, d_head=d_head)

    def const(*shape):
        return pl.BlockSpec(shape, lambda b, qi: (0,) * len(shape))

    return pl.pallas_call(
        kernel,
        out_shape=jax.ShapeDtypeStruct((B, Lq, d_embed), x.dtype),
        grid_spec=pltpu.PrefetchScalarGridSpec(
            num_scalar_prefetch=0,
            grid=(B, n_q_tiles),
            in_specs=[
                pl.BlockSpec((None, tile_q, d_embed), lambda b, qi: (b, qi, 0)),  # x
                pl.BlockSpec((None, Lkv, d_cross), lambda b, qi: (b, 0, 0)),      # y
                const(d_embed, d_embed), const(1, d_embed),                        # Wq^T, bq
                const(d_cross, d_embed), const(1, d_embed),                        # Wk^T, bk
                const(d_cross, d_embed), const(1, d_embed),                        # Wv^T, bv
                const(d_embed, d_embed), const(1, d_embed),                        # Wo^T, bo
            ],
            out_specs=pl.BlockSpec((None, tile_q, d_embed), lambda b, qi: (b, qi, 0)),
            scratch_shapes=[pltpu.VMEM((tile_q, d_embed), jnp.float32)],
        ),
        compiler_params=pltpu.CompilerParams(
            dimension_semantics=("parallel", "parallel"),
            vmem_limit_bytes=64 * 1024 * 1024,
        ),
    )(x, y, wq, bq, wk, bk, wv, bv, wo, bo)


def _ref_cross_attention(x, y, params, *, n_heads):
    """Pure-JAX reference reproducing the PyTorch forward exactly."""
    wq, bq, wk, bk, wv, bv, wo, bo = params
    B, Lq, d_embed = x.shape
    d_head = d_embed // n_heads

    q = x @ wq + bq            # (B, Lq, d_embed)
    k = y @ wk + bk            # (B, Lkv, d_embed)
    v = y @ wv + bv

    def split(t):
        Bt, L, _ = t.shape
        return t.reshape(Bt, L, n_heads, d_head).transpose(0, 2, 1, 3)  # (B, H, L, dh)

    qh, kh, vh = split(q), split(k), split(v)
    w = jnp.einsum('bhqd,bhkd->bhqk', qh, kh) / math.sqrt(d_head)
    w = jax.nn.softmax(w, axis=-1)
    o = jnp.einsum('bhqk,bhkd->bhqd', w, vh)
    o = o.transpose(0, 2, 1, 3).reshape(B, Lq, d_embed)
    return o @ wo + bo


if __name__ == "__main__":
    # Small but lane-dense shapes consistent with the module's forward.
    B, Lq, Lkv = 2, 16, 8
    d_embed, d_cross, n_heads = 128, 64, 4

    key = jax.random.PRNGKey(0)
    ks = jax.random.split(key, 10)

    def init_linear(kw, kb, d_in, d_out):
        # Deterministic init mimicking nn.Linear's uniform(-1/sqrt(d_in), 1/sqrt(d_in)).
        bound = 1.0 / math.sqrt(d_in)
        w = jax.random.uniform(kw, (d_in, d_out), jnp.float32, -bound, bound)  # pre-transposed
        b = jax.random.uniform(kb, (1, d_out), jnp.float32, -bound, bound)
        return w, b

    wq, bq = init_linear(ks[0], ks[1], d_embed, d_embed)
    wk, bk = init_linear(ks[2], ks[3], d_cross, d_embed)
    wv, bv = init_linear(ks[4], ks[5], d_cross, d_embed)
    wo, bo = init_linear(ks[6], ks[7], d_embed, d_embed)
    params = (wq, bq, wk, bk, wv, bv, wo, bo)

    x = jax.random.normal(ks[8], (B, Lq, d_embed), jnp.float32)
    y = jax.random.normal(ks[9], (B, Lkv, d_cross), jnp.float32)

    out = cross_attention(x, y, params, n_heads=n_heads)
    out = jax.block_until_ready(out)

    ref = _ref_cross_attention(x, y, params, n_heads=n_heads)
    assert out.shape == (B, Lq, d_embed)
    # tolerance slightly looser than 1e-4 because of the approx (EUP) reciprocal in softmax
    assert jnp.allclose(out, ref, atol=2e-3, rtol=2e-3), \
        f"max abs err {jnp.max(jnp.abs(out - ref))}"

    print("KERNEL_OK")
</pallas_src>

<mosaic_0001>
module attributes {stable_mosaic.version = 11 : i64} {
  func.func @_cross_attn_kernel(%arg0: i32, %arg1: i32, %arg2: memref<1x16x128xf32, #tpu.memory_space<vmem>>, %arg3: memref<1x8x64xf32, #tpu.memory_space<vmem>>, %arg4: memref<128x128xf32, #tpu.memory_space<vmem>>, %arg5: memref<1x128xf32, #tpu.memory_space<vmem>>, %arg6: memref<64x128xf32, #tpu.memory_space<vmem>>, %arg7: memref<1x128xf32, #tpu.memory_space<vmem>>, %arg8: memref<64x128xf32, #tpu.memory_space<vmem>>, %arg9: memref<1x128xf32, #tpu.memory_space<vmem>>, %arg10: memref<128x128xf32, #tpu.memory_space<vmem>>, %arg11: memref<1x128xf32, #tpu.memory_space<vmem>>, %arg12: memref<1x16x128xf32, #tpu.memory_space<vmem>>, %arg13: memref<16x128xf32, #tpu.memory_space<vmem>>) attributes {dimension_semantics = [#tpu.dimension_semantics<parallel>, #tpu.dimension_semantics<parallel>], iteration_bounds = array<i64: 2, 1>, scalar_prefetch = 0 : i64, scratch_operands = 1 : i64, tpu.core_type = #tpu.core_type<tc>, window_params = [{transform_indices = @transform_0, window_bounds = array<i64: 1, 16, 128>}, {transform_indices = @transform_1, window_bounds = array<i64: 1, 8, 64>}, {pipeline_mode = #tpu.pipeline_mode<synchronous>, transform_indices = @transform_2, window_bounds = array<i64: 128, 128>}, {pipeline_mode = #tpu.pipeline_mode<synchronous>, transform_indices = @transform_3, window_bounds = array<i64: 1, 128>}, {pipeline_mode = #tpu.pipeline_mode<synchronous>, transform_indices = @transform_4, window_bounds = array<i64: 64, 128>}, {pipeline_mode = #tpu.pipeline_mode<synchronous>, transform_indices = @transform_5, window_bounds = array<i64: 1, 128>}, {pipeline_mode = #tpu.pipeline_mode<synchronous>, transform_indices = @transform_6, window_bounds = array<i64: 64, 128>}, {pipeline_mode = #tpu.pipeline_mode<synchronous>, transform_indices = @transform_7, window_bounds = array<i64: 1, 128>}, {pipeline_mode = #tpu.pipeline_mode<synchronous>, transform_indices = @transform_8, window_bounds = array<i64: 128, 128>}, {pipeline_mode = #tpu.pipeline_mode<synchronous>, transform_indices = @transform_9, window_bounds = array<i64: 1, 128>}, {transform_indices = @transform_10, window_bounds = array<i64: 1, 16, 128>}]} {
    %c0 = arith.constant 0 : index
    %c0_0 = arith.constant 0 : index
    %c0_1 = arith.constant 0 : index
    %0 = vector.load %arg2[%c0, %c0_0, %c0_1] : memref<1x16x128xf32, #tpu.memory_space<vmem>>, vector<1x16x128xf32>
    %1 = vector.shape_cast %0 : vector<1x16x128xf32> to vector<16x128xf32>
    %c0_2 = arith.constant 0 : index
    %c0_3 = arith.constant 0 : index
    %c0_4 = arith.constant 0 : index
    %2 = vector.load %arg3[%c0_2, %c0_3, %c0_4] : memref<1x8x64xf32, #tpu.memory_space<vmem>>, vector<1x8x64xf32>
    %3 = vector.shape_cast %2 : vector<1x8x64xf32> to vector<8x64xf32>
    %c0_5 = arith.constant 0 : index
    %c0_6 = arith.constant 0 : index
    %4 = vector.load %arg4[%c0_5, %c0_6] : memref<128x128xf32, #tpu.memory_space<vmem>>, vector<128x128xf32>
    %cst = arith.constant dense<0.000000e+00> : vector<16x128xf32>
    %5 = tpu.matmul %1, %4, %cst {dimension_numbers = #tpu.dot_dimension_numbers<[1], [0], [0], [1], [0, 0, 1, 1], [], []>} : vector<16x128xf32>, vector<128x128xf32>, vector<16x128xf32> -> vector<16x128xf32>
    %c0_7 = arith.constant 0 : index
    %c0_8 = arith.constant 0 : index
    %6 = vector.load %arg5[%c0_7, %c0_8] : memref<1x128xf32, #tpu.memory_space<vmem>>, vector<1x128xf32>
    %7 = vector.broadcast %6 : vector<1x128xf32> to vector<16x128xf32>
    %8 = arith.addf %5, %7 : vector<16x128xf32>
    %c0_9 = arith.constant 0 : index
    %c0_10 = arith.constant 0 : index
    %9 = vector.load %arg6[%c0_9, %c0_10] : memref<64x128xf32, #tpu.memory_space<vmem>>, vector<64x128xf32>
    %cst_11 = arith.constant dense<0.000000e+00> : vector<8x128xf32>
    %10 = tpu.matmul %3, %9, %cst_11 {dimension_numbers = #tpu.dot_dimension_numbers<[1], [0], [0], [1], [0, 0, 1, 1], [], []>} : vector<8x64xf32>, vector<64x128xf32>, vector<8x128xf32> -> vector<8x128xf32>
    %c0_12 = arith.constant 0 : index
    %c0_13 = arith.constant 0 : index
    %11 = vector.load %arg7[%c0_12, %c0_13] : memref<1x128xf32, #tpu.memory_space<vmem>>, vector<1x128xf32>
    %12 = vector.broadcast %11 : vector<1x128xf32> to vector<8x128xf32>
    %13 = arith.addf %10, %12 : vector<8x128xf32>
    %c0_14 = arith.constant 0 : index
    %c0_15 = arith.constant 0 : index
    %14 = vector.load %arg8[%c0_14, %c0_15] : memref<64x128xf32, #tpu.memory_space<vmem>>, vector<64x128xf32>
    %cst_16 = arith.constant dense<0.000000e+00> : vector<8x128xf32>
    %15 = tpu.matmul %3, %14, %cst_16 {dimension_numbers = #tpu.dot_dimension_numbers<[1], [0], [0], [1], [0, 0, 1, 1], [], []>} : vector<8x64xf32>, vector<64x128xf32>, vector<8x128xf32> -> vector<8x128xf32>
    %c0_17 = arith.constant 0 : index
    %c0_18 = arith.constant 0 : index
    %16 = vector.load %arg9[%c0_17, %c0_18] : memref<1x128xf32, #tpu.memory_space<vmem>>, vector<1x128xf32>
    %17 = vector.broadcast %16 : vector<1x128xf32> to vector<8x128xf32>
    %18 = arith.addf %15, %17 : vector<8x128xf32>
    %cst_19 = arith.constant 0.176776692 : f32
    %19 = vector.broadcast %cst_19 : f32 to vector<16x128xf32>
    %20 = arith.mulf %8, %19 : vector<16x128xf32>
    %21 = vector.extract_strided_slice %20 {offsets = [0, 0], sizes = [16, 32], strides = [1, 1]} : vector<16x128xf32> to vector<16x32xf32>
    %22 = vector.extract_strided_slice %20 {offsets = [0, 32], sizes = [16, 32], strides = [1, 1]} : vector<16x128xf32> to vector<16x32xf32>
    %23 = vector.extract_strided_slice %20 {offsets = [0, 64], sizes = [16, 32], strides = [1, 1]} : vector<16x128xf32> to vector<16x32xf32>
    %24 = vector.extract_strided_slice %20 {offsets = [0, 96], sizes = [16, 32], strides = [1, 1]} : vector<16x128xf32> to vector<16x32xf32>
    %25 = vector.shape_cast %21 : vector<16x32xf32> to vector<1x16x32xf32>
    %26 = vector.shape_cast %22 : vector<16x32xf32> to vector<1x16x32xf32>
    %27 = vector.shape_cast %23 : vector<16x32xf32> to vector<1x16x32xf32>
    %28 = vector.shape_cast %24 : vector<16x32xf32> to vector<1x16x32xf32>
    %29 = tpu.concatenate %25, %26, %27, %28 in 0 : vector<1x16x32xf32>, vector<1x16x32xf32>, vector<1x16x32xf32>, vector<1x16x32xf32> -> vector<4x16x32xf32>
    %30 = vector.extract_strided_slice %13 {offsets = [0, 0], sizes = [8, 32], strides = [1, 1]} : vector<8x128xf32> to vector<8x32xf32>
    %31 = vector.extract_strided_slice %13 {offsets = [0, 32], sizes = [8, 32], strides = [1, 1]} : vector<8x128xf32> to vector<8x32xf32>
    %32 = vector.extract_strided_slice %13 {offsets = [0, 64], sizes = [8, 32], strides = [1, 1]} : vector<8x128xf32> to vector<8x32xf32>
    %33 = vector.extract_strided_slice %13 {offsets = [0, 96], sizes = [8, 32], strides = [1, 1]} : vector<8x128xf32> to vector<8x32xf32>
    %34 = vector.shape_cast %30 : vector<8x32xf32> to vector<1x8x32xf32>
    %35 = vector.shape_cast %31 : vector<8x32xf32> to vector<1x8x32xf32>
    %36 = vector.shape_cast %32 : vector<8x32xf32> to vector<1x8x32xf32>
    %37 = vector.shape_cast %33 : vector<8x32xf32> to vector<1x8x32xf32>
    %38 = tpu.concatenate %34, %35, %36, %37 in 0 : vector<1x8x32xf32>, vector<1x8x32xf32>, vector<1x8x32xf32>, vector<1x8x32xf32> -> vector<4x8x32xf32>
    %39 = vector.extract_strided_slice %18 {offsets = [0, 0], sizes = [8, 32], strides = [1, 1]} : vector<8x128xf32> to vector<8x32xf32>
    %40 = vector.extract_strided_slice %18 {offsets = [0, 32], sizes = [8, 32], strides = [1, 1]} : vector<8x128xf32> to vector<8x32xf32>
    %41 = vector.extract_strided_slice %18 {offsets = [0, 64], sizes = [8, 32], strides = [1, 1]} : vector<8x128xf32> to vector<8x32xf32>
    %42 = vector.extract_strided_slice %18 {offsets = [0, 96], sizes = [8, 32], strides = [1, 1]} : vector<8x128xf32> to vector<8x32xf32>
    %43 = vector.shape_cast %39 : vector<8x32xf32> to vector<1x8x32xf32>
    %44 = vector.shape_cast %40 : vector<8x32xf32> to vector<1x8x32xf32>
    %45 = vector.shape_cast %41 : vector<8x32xf32> to vector<1x8x32xf32>
    %46 = vector.shape_cast %42 : vector<8x32xf32> to vector<1x8x32xf32>
    %47 = tpu.concatenate %43, %44, %45, %46 in 0 : vector<1x8x32xf32>, vector<1x8x32xf32>, vector<1x8x32xf32>, vector<1x8x32xf32> -> vector<4x8x32xf32>
    "tpu.trace_start"() <{level = 10 : i32, message = "hqd,hkd->hqk"}> : () -> ()
    %cst_20 = arith.constant dense<0.000000e+00> : vector<4x16x8xf32>
    %48 = tpu.matmul %29, %38, %cst_20 {dimension_numbers = #tpu.dot_dimension_numbers<[2], [2], [1], [1], [0, 0, 0, 1, 1, 1], [0], [0]>} : vector<4x16x32xf32>, vector<4x8x32xf32>, vector<4x16x8xf32> -> vector<4x16x8xf32>
    "tpu.trace_stop"() : () -> ()
    %cst_21 = arith.constant dense<0xFF800000> : vector<4x16xf32>
    %49 = vector.multi_reduction <maximumf>, %48, %cst_21 [2] : vector<4x16x8xf32> to vector<4x16xf32>
    %50 = vector.shape_cast %49 : vector<4x16xf32> to vector<4x16x1xf32>
    %51 = vector.broadcast %50 : vector<4x16x1xf32> to vector<4x16x8xf32>
    %52 = arith.subf %48, %51 : vector<4x16x8xf32>
    %53 = math.exp %52 : vector<4x16x8xf32>
    %cst_22 = arith.constant dense<0.000000e+00> : vector<4x16xf32>
    %54 = vector.multi_reduction <add>, %53, %cst_22 [2] : vector<4x16x8xf32> to vector<4x16xf32>
    %55 = vector.shape_cast %54 : vector<4x16xf32> to vector<4x16x1xf32>
    %56 = tpu.reciprocal %55 {approx = true} : vector<4x16x1xf32> -> vector<4x16x1xf32>
    %57 = vector.broadcast %56 : vector<4x16x1xf32> to vector<4x16x8xf32>
    %58 = arith.mulf %53, %57 : vector<4x16x8xf32>
    "tpu.trace_start"() <{level = 10 : i32, message = "hqk,hkd->hqd"}> : () -> ()
    %cst_23 = arith.constant dense<0.000000e+00> : vector<4x16x32xf32>
    %59 = tpu.matmul %58, %47, %cst_23 {dimension_numbers = #tpu.dot_dimension_numbers<[2], [1], [1], [2], [0, 0, 0, 1, 1, 2], [0], [0]>} : vector<4x16x8xf32>, vector<4x8x32xf32>, vector<4x16x32xf32> -> vector<4x16x32xf32>
    "tpu.trace_stop"() : () -> ()
    %60 = vector.extract_strided_slice %59 {offsets = [0, 0, 0], sizes = [1, 16, 32], strides = [1, 1, 1]} : vector<4x16x32xf32> to vector<1x16x32xf32>
    %61 = vector.shape_cast %60 : vector<1x16x32xf32> to vector<16x32xf32>
    %c0_24 = arith.constant 0 : index
    %c0_25 = arith.constant 0 : index
    %62 = vector.load %arg13[%c0_24, %c0_25] : memref<16x128xf32, #tpu.memory_space<vmem>>, vector<16x32xf32>
    tpu.vector_store %arg13[%c0_24, %c0_25], %61 {strides = array<i32>} : memref<16x128xf32, #tpu.memory_space<vmem>>, vector<16x32xf32>,
    %63 = vector.extract_strided_slice %59 {offsets = [1, 0, 0], sizes = [1, 16, 32], strides = [1, 1, 1]} : vector<4x16x32xf32> to vector<1x16x32xf32>
    %64 = vector.shape_cast %63 : vector<1x16x32xf32> to vector<16x32xf32>
    %c0_26 = arith.constant 0 : index
    %c32 = arith.constant 32 : index
    %65 = vector.load %arg13[%c0_26, %c32] : memref<16x128xf32, #tpu.memory_space<vmem>>, vector<16x32xf32>
    tpu.vector_store %arg13[%c0_26, %c32], %64 {strides = array<i32>} : memref<16x128xf32, #tpu.memory_space<vmem>>, vector<16x32xf32>,
    %66 = vector.extract_strided_slice %59 {offsets = [2, 0, 0], sizes = [1, 16, 32], strides = [1, 1, 1]} : vector<4x16x32xf32> to vector<1x16x32xf32>
    %67 = vector.shape_cast %66 : vector<1x16x32xf32> to vector<16x32xf32>
    %c0_27 = arith.constant 0 : index
    %c64 = arith.constant 64 : index
    %68 = vector.load %arg13[%c0_27, %c64] : memref<16x128xf32, #tpu.memory_space<vmem>>, vector<16x32xf32>
    tpu.vector_store %arg13[%c0_27, %c64], %67 {strides = array<i32>} : memref<16x128xf32, #tpu.memory_space<vmem>>, vector<16x32xf32>,
    %69 = vector.extract_strided_slice %59 {offsets = [3, 0, 0], sizes = [1, 16, 32], strides = [1, 1, 1]} : vector<4x16x32xf32> to vector<1x16x32xf32>
    %70 = vector.shape_cast %69 : vector<1x16x32xf32> to vector<16x32xf32>
    %c0_28 = arith.constant 0 : index
    %c96 = arith.constant 96 : index
    %71 = vector.load %arg13[%c0_28, %c96] : memref<16x128xf32, #tpu.memory_space<vmem>>, vector<16x32xf32>
    tpu.vector_store %arg13[%c0_28, %c96], %70 {strides = array<i32>} : memref<16x128xf32, #tpu.memory_space<vmem>>, vector<16x32xf32>,
    %c0_29 = arith.constant 0 : index
    %c0_30 = arith.constant 0 : index
    %72 = vector.load %arg13[%c0_29, %c0_30] : memref<16x128xf32, #tpu.memory_space<vmem>>, vector<16x128xf32>
    %c0_31 = arith.constant 0 : index
    %c0_32 = arith.constant 0 : index
    %73 = vector.load %arg10[%c0_31, %c0_32] : memref<128x128xf32, #tpu.memory_space<vmem>>, vector<128x128xf32>
    %cst_33 = arith.constant dense<0.000000e+00> : vector<16x128xf32>
    %74 = tpu.matmul %72, %73, %cst_33 {dimension_numbers = #tpu.dot_dimension_numbers<[1], [0], [0], [1], [0, 0, 1, 1], [], []>} : vector<16x128xf32>, vector<128x128xf32>, vector<16x128xf32> -> vector<16x128xf32>
    %c0_34 = arith.constant 0 : index
    %c0_35 = arith.constant 0 : index
    %75 = vector.load %arg11[%c0_34, %c0_35] : memref<1x128xf32, #tpu.memory_space<vmem>>, vector<1x128xf32>
    %76 = vector.broadcast %75 : vector<1x128xf32> to vector<16x128xf32>
    %77 = arith.addf %74, %76 : vector<16x128xf32>
    %c0_36 = arith.constant 0 : index
    %c0_37 = arith.constant 0 : index
    %c0_38 = arith.constant 0 : index
    %78 = vector.load %arg12[%c0_36, %c0_37, %c0_38] : memref<1x16x128xf32, #tpu.memory_space<vmem>>, vector<1x16x128xf32>
    %79 = vector.shape_cast %78 : vector<1x16x128xf32> to vector<16x128xf32>
    %80 = vector.shape_cast %77 : vector<16x128xf32> to vector<1x16x128xf32>
    tpu.vector_store %arg12[%c0_36, %c0_37, %c0_38], %80 {strides = array<i32>} : memref<1x16x128xf32, #tpu.memory_space<vmem>>, vector<1x16x128xf32>,
    return
  }
  func.func @transform_0(%arg0: i32, %arg1: i32) -> (i32, i32, i32) {
    %c0_i32 = arith.constant 0 : i32
    %c0_i32_0 = arith.constant 0 : i32
    return %arg0, %arg1, %c0_i32 : i32, i32, i32
  }
  func.func @transform_1(%arg0: i32, %arg1: i32) -> (i32, i32, i32) {
    %c0_i32 = arith.constant 0 : i32
    %c0_i32_0 = arith.constant 0 : i32
    %c0_i32_1 = arith.constant 0 : i32
    return %arg0, %c0_i32, %c0_i32_0 : i32, i32, i32
  }
  func.func @transform_2(%arg0: i32, %arg1: i32) -> (i32, i32) {
    %c0_i32 = arith.constant 0 : i32
    %c0_i32_0 = arith.constant 0 : i32
    %c0_i32_1 = arith.constant 0 : i32
    return %c0_i32, %c0_i32_0 : i32, i32
  }
  func.func @transform_3(%arg0: i32, %arg1: i32) -> (i32, i32) {
    %c0_i32 = arith.constant 0 : i32
    %c0_i32_0 = arith.constant 0 : i32
    %c0_i32_1 = arith.constant 0 : i32
    return %c0_i32, %c0_i32_0 : i32, i32
  }
  func.func @transform_4(%arg0: i32, %arg1: i32) -> (i32, i32) {
    %c0_i32 = arith.constant 0 : i32
    %c0_i32_0 = arith.constant 0 : i32
    %c0_i32_1 = arith.constant 0 : i32
    return %c0_i32, %c0_i32_0 : i32, i32
  }
  func.func @transform_5(%arg0: i32, %arg1: i32) -> (i32, i32) {
    %c0_i32 = arith.constant 0 : i32
    %c0_i32_0 = arith.constant 0 : i32
    %c0_i32_1 = arith.constant 0 : i32
    return %c0_i32, %c0_i32_0 : i32, i32
  }
  func.func @transform_6(%arg0: i32, %arg1: i32) -> (i32, i32) {
    %c0_i32 = arith.constant 0 : i32
    %c0_i32_0 = arith.constant 0 : i32
    %c0_i32_1 = arith.constant 0 : i32
    return %c0_i32, %c0_i32_0 : i32, i32
  }
  func.func @transform_7(%arg0: i32, %arg1: i32) -> (i32, i32) {
    %c0_i32 = arith.constant 0 : i32
    %c0_i32_0 = arith.constant 0 : i32
    %c0_i32_1 = arith.constant 0 : i32
    return %c0_i32, %c0_i32_0 : i32, i32
  }
  func.func @transform_8(%arg0: i32, %arg1: i32) -> (i32, i32) {
    %c0_i32 = arith.constant 0 : i32
    %c0_i32_0 = arith.constant 0 : i32
    %c0_i32_1 = arith.constant 0 : i32
    return %c0_i32, %c0_i32_0 : i32, i32
  }
  func.func @transform_9(%arg0: i32, %arg1: i32) -> (i32, i32) {
    %c0_i32 = arith.constant 0 : i32
    %c0_i32_0 = arith.constant 0 : i32
    %c0_i32_1 = arith.constant 0 : i32
    return %c0_i32, %c0_i32_0 : i32, i32
  }
  func.func @transform_10(%arg0: i32, %arg1: i32) -> (i32, i32, i32) {
    %c0_i32 = arith.constant 0 : i32
    %c0_i32_0 = arith.constant 0 : i32
    return %arg0, %arg1, %c0_i32 : i32, i32, i32
  }
}

</mosaic_0001>

<bundles_post_ra>
// kernel: tpu_custom_call.1
= control target key start
LH: loop header
LB: loop body
LE: loop exit
PB: predicated region body
PF: predicated region fallthrough
CT: control target
= control target key end

     0   :  { %s2072_s0 = inlined_call_operand.hbm [shape: f32[2,16,128], index: 0, kind: input, shape index: {}]   ;;  %s2073_s1 = inlined_call_operand.hbm [shape: f32[2,8,64], index: 1, kind: input, shape index: {}]   ;;  %s2074_s2 = inlined_call_operand.hbm [shape: f32[128,128], index: 2, kind: input, shape index: {}]   ;;  %s2075_s3 = inlined_call_operand.vmem [shape: f32[1,128], index: 3, kind: input, shape index: {}]   ;;  %s2076_s4 = inlined_call_operand.hbm [shape: f32[64,128], index: 4, kind: input, shape index: {}]   ;;  %s2077_s5 = inlined_call_operand.vmem [shape: f32[1,128], index: 5, kind: input, shape index: {}]   ;;  %s2078_s6 = inlined_call_operand.hbm [shape: f32[64,128], index: 6, kind: input, shape index: {}]   ;;  %s2079_s7 = inlined_call_operand.vmem [shape: f32[1,128], index: 7, kind: input, shape index: {}]   ;;  %s2080_s8 = inlined_call_operand.hbm [shape: f32[128,128], index: 8, kind: input, shape index: {}]   ;;  %s2081_s9 = inlined_call_operand.vmem [shape: f32[1,128], index: 9, kind: input, shape index: {}]   ;;  %s2082_s10 = inlined_call_operand.hbm [shape: f32[2,16,128], index: 10, kind: output, shape index: {}]  }
   0x1   :  { %2092 = sst [smem:[#allocation27_spill]] %s2074_s2 }
   0x2   :  { %2093 = sst [smem:[#allocation28_spill]] %s2076_s4 }
   0x3   :  { %2094 = sst [smem:[#allocation29_spill]] %s2078_s6 }
   0x4   :  { %2095 = sst [smem:[#allocation30_spill]] %s2080_s8 }
   0x5   :  { %2096 = sst [smem:[#allocation31_spill]] %s2082_s10 }
   0x6   :  { %15 = vsyncpa [#allocation4], 0 }
   0x7   :  { %17 = vsyncpa [#allocation4 + $0x1], 0 }
   0x8   :  { %18 = vsyncpa [#allocation7], 0 }
   0x9   :  { %20 = vsyncpa [#allocation7 + $0x1], 0 }
   0xa   :  { %21 = vsyncpa [#allocation10], 0 }
   0xb   :  { %22 = vsyncpa [#allocation13], 0 }
   0xc   :  { %23 = vsyncpa [#allocation5], 0 }
   0xd   :  { %25 = vsyncpa [#allocation5 + $0x1], 0  ;;  %s1770_s13 = smov 0   ;;  %s1772_s14 = smov 0  }
   0xe   :  { %s1774_s15 = smov 0   ;;  %s1776_s16 = smov 0  }
   0xf   :  { %s1778_s17 = smov 0   ;;  %s1780_s18 = smov 0  }
  0x10 LB: > { %2097 = sst [smem:[#allocation21_spill]] %s1682_s13  ;;  %s1801_s19 = sadd.s32 4294967295, %s1702_s18   ;;  %s1702_s18 = sphi %s1780_s18, %s31_s18   ;;  %s1698_s17 = sphi %s1778_s17, %s2126_s17   ;;  %s1694_s16 = sphi %s1776_s16, %s2125_s16   ;;  %s1690_s15 = sphi %s1774_s15, %s2121_s15   ;;  %s1686_s14 = sphi %s1772_s14, %s2124_s14   ;;  %s1682_s13 = sphi %s1770_s13, %s2123_s13  }
  0x11   : > { %2098 = sst [smem:[#allocation22_spill]] %s1690_s15  ;;  %s1223_s20 = sadd.s32 4294967294, %s1702_s18  }
  0x12   : > { %p65_p0 = scmp.ne.s32.totalorder %s1686_s14, %s1682_s13  ;;  %p66_p1 = scmp.eq.s32.totalorder %s1801_s19, 0 }
  0x13   : > { %p285_p2 = scmp.eq.s32.totalorder %s1801_s19, 1  ;;  %p291_p3 = scmp.eq.s32.totalorder %s1223_s20, 1 }
  0x14   : > { %p1810_p4 = por %p66_p1, %p65_p0  ;;  %p1224_p5 = scmp.ge.s32.totalorder %s1702_s18, 1 }
  0x15   : > { %p1815_p6 = por %p291_p3, %p65_p0  ;;  %p298_p7 = scmp.lt.s32.totalorder %s1702_s18, 3 }
  0x16   : > { %s2102_s2 = sld [smem:[#allocation27_spill]]  ;;  %s1704_s27 = smov [#allocation8]  }
  0x17   : > { %s2100_s22 = scalar_select %p1815_p6, 1, 0 }
  0x18   : > { %p1823_p8 = pnand %p1224_p5, %p298_p7  ;;  %s311_s28 = sshll.u32 %s1704_s27, 4  ;;  %s312_s28 = int_to_ptr.vmem [resolvable:$true] %s311_s28 }
  0x19   : > { %2101 = sst [smem:[#allocation23_spill]] %s2100_s22  ;;  %p1229_p11 = scmp.ge.s32.totalorder %s1702_s18, 2 }
  0x1a   : > { %p1295_p9 = pneg %p1823_p8  ;;  %s2105_s4 = sld [smem:[#allocation28_spill]] }
  0x1b   : > { %s2085_s20 = smov 128   ;;  %s2086_s23 = smov 8  }
  0x1c   : > { %s309_s25 = sshll.u32 %s2102_s2, 4  ;;  %p1831_p10 = pnand %p1295_p9, %p66_p1  ;;  %s310_s25 = int_to_ptr.hbm [resolvable:$true] %s309_s25 }
  0x1d   : > { %s1707_s24 = smov [#allocation9]   ;;  %s2106_s6 = sld [smem:[#allocation29_spill]] }
  0x1e   : > { %1298 = dma.hbm_to_vmem [thread:$0]  (!%p1831_p10), %s310_s25, 2048, %s312_s28, [#allocation7], %s2085_s20, %s2085_s20, %s2086_s23  }
  0x1f   : > { %s328_s27 = sshll.u32 %s1707_s24, 4  ;;  %s2107_s8 = sld [smem:[#allocation30_spill]]  ;;  %s329_s27 = int_to_ptr.vmem [resolvable:$true] %s328_s27 }
  0x20   : > { %s326_s12 = sshll.u32 %s2105_s4, 4  ;;  %s1708_s11 = smov [#allocation11]   ;;  %s327_s12 = int_to_ptr.hbm [resolvable:$true] %s326_s12 }
  0x21   : > { %1301 = dma.hbm_to_vmem [thread:$0]  (!%p1831_p10), %s327_s12, 1024, %s329_s27, [#allocation10], %s2085_s20, %s2085_s20, %s2086_s23  }
  0x22   : > { %s345_s24 = sshll.u32 %s1708_s11, 4  ;;  %s1709_s2 = smov [#allocation12]   ;;  %s346_s24 = int_to_ptr.vmem [resolvable:$true] %s345_s24 }
  0x23   : > { %s343_s13 = sshll.u32 %s2106_s6, 4  ;;  %s362_s22 = sshll.u32 %s1709_s2, 4  ;;  %s344_s13 = int_to_ptr.hbm [resolvable:$true] %s343_s13  ;;  %s363_s22 = int_to_ptr.vmem [resolvable:$true] %s362_s22 }
  0x24   : > { %1304 = dma.hbm_to_vmem [thread:$0]  (!%p1831_p10), %s344_s13, 1024, %s346_s24, [#allocation10], %s2085_s20, %s2085_s20, %s2086_s23  }
  0x25   : > { %s360_s30 = sshll.u32 %s2107_s8, 4  ;;  %s43_s12 = sadd.s32 1, %s1698_s17  ;;  %s361_s30 = int_to_ptr.hbm [resolvable:$true] %s360_s30 }
  0x26   : > { %1307 = dma.hbm_to_vmem [thread:$0]  (!%p1831_p10), %s361_s30, 2048, %s363_s22, [#allocation13], %s2085_s20, %s2085_s20, %s2086_s23  }
  0x27   : > { %s52_s27 = sadd.s32 1, %s1690_s15  ;;  %p45_p12 = scmp.ge.s32.totalorder %s43_s12, 2 }
  0x28   : > { %p59_p13 = scmp.ne.s32.totalorder %s1690_s15, %s1686_s14  ;;  %p60_p0 = scmp.eq.s32.totalorder %s1702_s18, 0 }
  0x29   : > { %p1323_p3 = scmp.lt.s32.totalorder %s1702_s18, 2  ;;  %s2128_s12 = smov (%p45_p12, %s43_s12), 0 }
  0x2a   : > { %2108 = sst [smem:[#allocation24_spill]] %s2128_s12  ;;  %p1873_p5 = por %p60_p0, %p59_p13 }
  0x2b   : > { %p1879_p7 = por %p285_p2, %p59_p13  ;;  %s47_s25 = ssub.s32 %s1698_s17, %s2128_s12 }
  0x2c   : > { %s379_s28 = sand.u32 1, %s1690_s15   ;;  %p50_p9 = scmp.eq.s32.totalorder %s47_s25, 0 }
  0x2d   : > { %s2110_s29 = scalar_select %p1879_p7, 1, 0 }
  0x2e   : > { %s1230_s30 = sshll.u32 %s379_s28, 4  ;;  %s1270_s11 = sshll.u32 %s1698_s17, 4 }
  0x2f   : > { %2111 = sst [smem:[#allocation25_spill]] %s2110_s29  ;;  %s390_s20 = scalar_lea.hbm %s2072_s0, %s1270_s11 }
  0x30   : > { %s1888_s24 = scalar_select %p50_p9, %s1690_s15, %s52_s27  }
  0x31   : > { %s391_s23 = sshll.u32 %s390_s20, 4  ;;  %s383_s4 = scalar_lea.vmem [#allocation3], %s1230_s30  ;;  %s392_s23 = int_to_ptr.hbm [resolvable:$true] %s391_s23 }
  0x32   : > { %2112 = sst [smem:[#allocation26_spill]] %s1888_s24  ;;  %s393_s6 = sshll.u32 %s383_s4, 4  ;;  %s394_s6 = int_to_ptr.vmem [resolvable:$true] %s393_s6 }
  0x33   : > { %p1309_p2 = pnand %p1323_p3, %p1873_p5  ;;  %s403_s8 = sand.u32 1, %s1702_s18  }
  0x34   : > { %s1233_s12 = sshll.u32 %s379_s28, 3  ;;  %s380_s10 = scalar_lea.sflag [#allocation4], %s379_s28 }
  0x35   : > { %s2113_s25 = smov 8   ;;  %s2114_s29 = smov 128  }
  0x36   : > { %1311 = dma.hbm_to_vmem [thread:$0]  (!%p1309_p2), %s392_s23, 256, %s394_s6, %s380_s10, %s2114_s29, %s2114_s29, %s2113_s25  }
  0x37   : > { %s1234_s27 = sshll.u32 %s1698_s17, 3  ;;  %s407_s24 = scalar_lea.vmem [#allocation6], %s1233_s12 }
  0x38   : > { %s415_s15 = sshll.u32 %s407_s24, 4  ;;  %s411_s20 = scalar_lea.hbm %s2073_s1, %s1234_s27  ;;  %s416_s15 = int_to_ptr.vmem [resolvable:$true] %s415_s15 }
  0x39   : > { %s413_s4 = sshll.u32 %s411_s20, 4  ;;  %s404_s13 = scalar_lea.sflag [#allocation7], %s403_s8  ;;  %s414_s4 = int_to_ptr.hbm [resolvable:$true] %s413_s4 }
  0x3a   : > { %1314 = dma.hbm_to_vmem [thread:$0]  (!%p1309_p2), %s414_s4, 128, %s416_s15, %s404_s13  }
  0x3b   : > { %424 = sbr.rel (%p1823_p8) target bundleno = 1169 (0x491), region = 60  ;;  %s1908_s28 = sand.u32 (!%p1823_p8), 1, %s1686_s14  }
  0x3c   : > { %s1236_s6 = sshll.u32 (!%p1823_p8), %s1908_s28, 4  ;;  %s427_s10 = scalar_lea.sflag (!%p1823_p8), [#allocation4], %s1908_s28 }
  0x3d   : > { %s1914_s23 = scalar_lea.vmem (!%p1823_p8), [#allocation3], %s1236_s6 }
  0x40   : > { %1657 = dma.done.wait (%p1810_p4), %s427_s10, 256  }
  0x41   : > { %1659 = vsyncadd (%p1810_p4), %s427_s10, 4294967040  ;;  %s436_s8 = sand.u32 1, %s1801_s19   ;;  %s1237_s15 = sshll.u32 %s1908_s28, 3 }
  0x42   : > { %s437_s26 = scalar_lea.sflag [#allocation7], %s436_s8  ;;  %s1922_s12 = scalar_lea.vmem [#allocation6], %s1237_s15 }
  0x43   : > { %1661 = dma.done.wait (%p1810_p4), %s437_s26, 128  }
  0x44   : > { %1663 = vsyncadd (%p1810_p4), %s437_s26, 4294967168 }
  0x45   : > { %1665 = dma.done.wait (%p66_p1), [#allocation7], 2048  }
  0x46   : > { %1667 = vsyncadd (%p66_p1), [#allocation7], 4294965248 }
  0x47   : > { %1669 = dma.done.wait (%p66_p1), [#allocation10], 2048  }
  0x48   : > { %1671 = vsyncadd (%p66_p1), [#allocation10], 4294965248 }
  0x49   : > { %1673 = dma.done.wait (%p66_p1), [#allocation13], 2048  }
  0x4a   : > { %1675 = vsyncadd (%p66_p1), [#allocation13], 4294965248  ;;  %v523_v0 = vld [vmem:[#allocation8 + $0x78] sm:$0xff]  ;;  %v522_v2 = vld [vmem:[#allocation8 + $0x70] sm:$0xff]  ;;  %vm563_vm0 = vcmask 523264   ;;  %vm652_vm1 = vcmask 261120  }
  0x4b   : > { %v558_v1 = vld [vmem:[#allocation9 + $0x38] sm:$0xff]  ;;  %528 = vmatpush.msra.mxu0 %v523_v0  ;;  %v557_v3 = vld [vmem:[#allocation9 + $0x30] sm:$0xff]  ;;  %v521_v4 = vld [vmem:[#allocation8 + $0x68] sm:$0xff]  ;;  %s1710_s29 = smov 32   ;;  %s1711_s30 = smov 96   ;;  %vm769_vm2 = vcmask 64512  }
  0x4c   : > { %575 = vmatpush.msra.mxu1 %v558_v1  ;;  %v556_v5 = vld [vmem:[#allocation9 + $0x28] sm:$0xff]  ;;  %v520_v6 = vld [vmem:[#allocation8 + $0x60] sm:$0xff]  ;;  %v519_v8 = vld [vmem:[#allocation8 + $0x58] sm:$0xff]  ;;  %s1712_s24 = smov 64   ;;  %vm984_vm3 = vcmask 523520   ;;  %vm995_vm4 = vcmask 785920  }
  0x4d   : > { %529 = vmatpush.msra.mxu0 %v522_v2  ;;  %v555_v7 = vld [vmem:[#allocation9 + $0x20] sm:$0xff]  ;;  %v554_v9 = vld [vmem:[#allocation9 + $0x18] sm:$0xff]  ;;  %v518_v10 = vld [vmem:[#allocation8 + $0x50] sm:$0xff]  ;;  %vm1006_vm5 = vcmask 1048320   ;;  %s1271_s4 = sshll.u32 %s1694_s16, 4  ;;  %s502_s10 = scalar_lea.vmem [#allocation14], %s1236_s6 }
  0x4e   : > { %576 = vmatpush.msra.mxu1 %v557_v3  ;;  %v553_v11 = vld [vmem:[#allocation9 + $0x10] sm:$0xff]  ;;  %v517_v12 = vld [vmem:[#allocation8 + $0x48] sm:$0xff]  ;;  %v594_v13 = vld [vmem:[#allocation11 + $0x38] sm:$0xff]  ;;  %s2116_s15 = sld [smem:[#allocation31_spill]]  ;;  %s1071_s19 = sshll.u32 %s502_s10, 4  ;;  %s1072_s19 = int_to_ptr.vmem [resolvable:$true] %s1071_s19 }
  0x4f   : > { %530 = vmatpush.msra.mxu0 %v521_v4  ;;  %v593_v14 = vld [vmem:[#allocation11 + $0x30] sm:$0xff]  ;;  %v552_v15 = vld [vmem:[#allocation9 + $0x8] sm:$0xff]  ;;  %607 = vmatpush.msra.mxu2 %v594_v13  ;;  %v516_v17 = vld [vmem:[#allocation8 + $0x40] sm:$0xff] }
  0x50   : > { %577 = vmatpush.msra.mxu1 %v556_v5  ;;  %v592_v16 = vld [vmem:[#allocation11 + $0x28] sm:$0xff]  ;;  %v551_v18 = vld [vmem:[#allocation9] sm:$0xff]  ;;  %v507_v19 = vld [vmem:[%s1922_s12] sm:$0xff] }
  0x51   : > { %531 = vmatpush.msra.mxu0 %v520_v6  ;;  %608 = vmatpush.msra.mxu2 %v593_v14  ;;  %v515_v20 = vld [vmem:[#allocation8 + $0x38] sm:$0xff]  ;;  %v514_v21 = vld [vmem:[#allocation8 + $0x30] sm:$0xff]  ;;  %v513_v22 = vld [vmem:[#allocation8 + $0x28] sm:$0xff] }
  0x52   : > { %578 = vmatpush.msra.mxu1 %v555_v7  ;;  %v512_v23 = vld [vmem:[#allocation8 + $0x20] sm:$0xff]  ;;  %v511_v24 = vld [vmem:[#allocation8 + $0x18] sm:$0xff]  ;;  %v510_v25 = vld [vmem:[#allocation8 + $0x10] sm:$0xff] }
  0x53   : > { %532 = vmatpush.msra.mxu0 %v519_v8  ;;  %609 = vmatpush.msra.mxu2 %v592_v16  ;;  %v509_v26 = vld [vmem:[#allocation8 + $0x8] sm:$0xff]  ;;  %v508_v27 = vld [vmem:[#allocation8] sm:$0xff]  ;;  %v590_v31 = vld [vmem:[#allocation11 + $0x18] sm:$0xff] }
  0x54   : > { %579 = vmatpush.msra.mxu1 %v554_v9  ;;  %v505_v28 = vld [vmem:[%s1914_s23] sm:$0xff]  ;;  %v506_v29 = vld [vmem:[%s1914_s23 + $0x8] sm:$0xff]  ;;  %s2117_s26 = smov %s2116_s15  ;;  %s1070_s12 = scalar_lea.hbm %s2116_s15, %s1271_s4 }
  0x55   : > { %533 = vmatpush.msra.mxu0 %v518_v10  ;;  %v591_v30 = vld [vmem:[#allocation11 + $0x20] sm:$0xff]  ;;  %v589_v32 = vld [vmem:[#allocation11 + $0x10] sm:$0xff]  ;;  %v588_v33 = vld [vmem:[#allocation11 + $0x8] sm:$0xff]  ;;  %s1073_s21 = sshll.u32 %s1070_s12, 4  ;;  %s1624_s22 = scalar_lea.hbm %s2117_s26, 32  ;;  %s1074_s21 = int_to_ptr.hbm [resolvable:$true] %s1073_s21 }
  0x56   : > { %580 = vmatpush.msra.mxu1 %v553_v11  ;;  %610 = vmatpush.msra.mxu2 %v591_v30  ;;  %v587_v34 = vld [vmem:[#allocation11] sm:$0xff] }
  0x57   : > { %534 = vmatpush.msra.mxu0 %v517_v12  ;;  %v1388_v35 = vld [vmem:[%s2077_s5] ss:$0 sm:$0xff] }
  0x58   : > { %581 = vmatpush.msra.mxu1 %v552_v15  ;;  %611 = vmatpush.msra.mxu2 %v590_v31  ;;  %v1389_v38 = vld [vmem:[%s2075_s3] ss:$0 sm:$0xff] }
  0x59   : > { %535 = vmatpush.msra.mxu0 %v516_v17  ;;  %v1390_v46 = vld [vmem:[%s2079_s7] ss:$0 sm:$0xff] }
  0x5a   : > { %582 = vmatpush.msra.mxu1 %v551_v18  ;;  %612 = vmatpush.msra.mxu2 %v589_v32 }
  0x5b   : > { %1243 = vmatmul.msk.f32.vlgmr.msra.gmra.mxu1 %vm563_vm0, %v507_v19  ;;  %536 = vmatpush.msra.mxu0 %v515_v20 }
  0x5c   : > { %613 = vmatpush.msra.mxu2 %v588_v33 }
  0x5d   : > { %537 = vmatpush.msra.mxu0 %v514_v21 }
  0x5e   : > { %614 = vmatpush.msra.mxu2 %v587_v34 }
  0x5f   : > { %538 = vmatpush.msra.mxu0 %v513_v22  ;;  %1244 = vmatmul.msk.f32.vlgmr.msra.gmra.mxu2 %vm563_vm0, %v507_v19 }
  0x61   : > { %539 = vmatpush.msra.mxu0 %v512_v23 }
  0x63   : > { %540 = vmatpush.msra.mxu0 %v511_v24 }
  0x65   : > { %541 = vmatpush.msra.mxu0 %v510_v25 }
  0x67   : > { %542 = vmatpush.msra.mxu0 %v509_v26 }
  0x69   : > { %543 = vmatpush.msra.mxu0 %v508_v27 }
  0x6a   : > { %544 = vmatmul.f32.vlgmr.msra.gmra.mxu0 %v505_v28 }
  0x72   : > { %547 = vmatmul.f32.gmra.mxu0 %v506_v29 }
  0xd8   : > { %v584_v36 = vpop.f32.mrf.mxu1 }
  0xd9   : > { %v585_v37 = vadd.f32 %v1388_v35, %v584_v36 }
  0xdb   : > { %640 = vrot.lane.b32.xlu1 %v585_v37, %s1710_s29  ;;  %636 = vrot.lane.b32.xlu0 %v585_v37, %s1711_s30 }
  0xdc   : > { %1245 = vmatpush.xpose.msk.msrb.mxu1 %vm652_vm1, %v585_v37  ;;  %1272 = vmatpush.xpose.msk.msrb.mxu2 %vm652_vm1, %v585_v37 }
  0xe2   : > { %v616_v47 = vpop.f32.mrf.mxu2 }
  0xe3   : > { %638 = vrot.lane.b32.xlu0 %v585_v37, %s1712_s24  ;;  %v1967_v50 = vadd.f32 %v1390_v46, %v616_v47 }
  0xe7   : > { %v545_v39 = vpop.f32.mrf.mxu0 }
  0xe8   : > { %v546_v40 = vadd.f32 %v1389_v38, %v545_v39 }
  0xea   : > { %v619_v41 = vmul.f32 0.17677669, %v546_v40 }
  0xec   : > { %627 = vrot.lane.b32.xlu2 %v619_v41, %s1712_s24  ;;  %623 = vrot.lane.b32.xlu1 %v619_v41, %s1711_s30 }
  0xed   : > { %1246 = vmatmul.msk.f32.vlgmr.msrb.gmra.mxu1 %vm652_vm1, %v619_v41 }
  0xef   : > { %v548_v42 = vpop.f32.mrf.mxu0 }
  0xf0   : > { %v549_v43 = vadd.f32 %v1389_v38, %v548_v42 }
  0xf2   : > { %v620_v44 = vmul.f32 0.17677669, %v549_v43 }
  0xf4   : > { %625 = vrot.lane.b32.xlu0 %v620_v44, %s1711_s30  ;;  %1247 = vmatmul.msk.f32.vlgmr.msrb.gmra.mxu2 %vm652_vm1, %v620_v44 }
  0xf5   : > { %631 = vrot.lane.b32.xlu2 %v619_v41, %s1710_s29  ;;  %629 = vrot.lane.b32.xlu1 %v620_v44, %s1712_s24 }
  0xfd   : > { %633 = vrot.lane.b32.xlu2 %v620_v44, %s1710_s29 }
 0x146   : > { %v628_v45 = vpop.permute.xlu2 %627 }
 0x14d   : > { %v641_v48 = vpop.permute.xlu1 %640  ;;  %v637_v49 = vpop.permute.xlu0 %636 }
 0x14e   : > { %1254 = vmatpush.xpose.msk.msra.mxu2 %vm652_vm1, %v641_v48  ;;  %1248 = vmatpush.xpose.msk.msra.mxu3 %vm652_vm1, %v637_v49 }
 0x14f   : > { %v632_v51 = vpop.permute.xlu2 %631 }
 0x151   : > { %1255 = vmatmul.msk.f32.vlgmr.msra.gmra.mxu2 %vm652_vm1, %v632_v51 }
 0x152   : > { %879 = vmatpush.msrb.mxu3 %v1967_v50 }
 0x155   : > { %v639_v52 = vpop.permute.xlu0 %638 }
 0x156   : > { %1251 = vmatpush.xpose.msk.msra.mxu1 %vm652_vm1, %v639_v52 }
 0x157   : > { %v634_v53 = vpop.permute.xlu2 %633 }
 0x159   : > { %1252 = vmatmul.msk.f32.vlgmr.msra.gmra.mxu1 %vm652_vm1, %v628_v45  ;;  %1256 = vmatmul.msk.f32.gmra.mxu2 %vm652_vm1, %v634_v53 }
 0x15e   : > { %v624_v54 = vpop.permute.xlu1 %623 }
 0x15f   : > { %1249 = vmatmul.msk.f32.vlgmr.msra.gmra.mxu3 %vm652_vm1, %v624_v54 }
 0x166   : > { %v626_v55 = vpop.permute.xlu0 %625 }
 0x167   : > { %v630_v56 = vpop.permute.xlu1 %629  ;;  %1250 = vmatmul.msk.f32.gmra.mxu3 %vm652_vm1, %v626_v55 }
 0x168   : > { %1253 = vmatmul.msk.f32.gmra.mxu1 %vm652_vm1, %v630_v56 }
 0x16a   : > { %v1981_v58 = vpop.f32.mrf.mxu1 }
 0x16b   : > { %v770_v8 = vsel %vm769_vm2, %v1981_v58, -inf }
 0x177   : > { %v1979_v57 = vpop.f32.mrf.mxu2 }
 0x178   : > { %v773_v63 = vsel %vm769_vm2, %v1979_v57, -inf }
 0x1d4   : > { %v763_v59 = vpop.f32.mrf.mxu2 }
 0x1d5   : > { %v788_v60 = vsel %vm769_vm2, %v763_v59, -inf }
 0x1d6   : > { %789 = vmax.xlane.f32.xlu2 %v788_v60  ;;  %v734_v61 = vpop.f32.mrf.mxu1 }
 0x1d7   : > { %v782_v62 = vsel %vm769_vm2, %v734_v61, -inf }
 0x1d8   : > { %783 = vmax.xlane.f32.xlu0 %v782_v62 }
 0x1dc   : > { %v766_v4 = vpop.f32.mrf.mxu2 }
 0x1dd   : > { %v791_v6 = vsel %vm769_vm2, %v766_v4, -inf }
 0x1e0   : > { %774 = vmax.xlane.f32.xlu0 %v773_v63 }
 0x1e2   : > { %v705_v0 = vpop.f32.mrf.mxu3 }
 0x1e3   : > { %v776_v1 = vsel %vm769_vm2, %v705_v0, -inf }
 0x1e4   : > { %777 = vmax.xlane.f32.xlu1 %v776_v1 }
 0x1e5   : > { %v737_v2 = vpop.f32.mrf.mxu1 }
 0x1e6   : > { %v785_v3 = vsel %vm769_vm2, %v737_v2, -inf }
 0x1e7   : > { %786 = vmax.xlane.f32.xlu2 %v785_v3 }
 0x1ea   : > { %v708_v5 = vpop.f32.mrf.mxu3 }
 0x1eb   : > { %v779_v7 = vsel %vm769_vm2, %v708_v5, -inf }
 0x1ec   : > { %792 = vmax.xlane.f32.xlu1 %v791_v6  ;;  %780 = vmax.xlane.f32.xlu0 %v779_v7 }
 0x1ef   : > { %771 = vmax.xlane.f32.xlu2 %v770_v8 }
 0x249   : > { %v790_v9 = vpop.xlane.xlu2 %789 }
 0x24a   : > { %v800_v10 = vsub.f32 %v763_v59, %v790_v9 }
 0x24b   : > { %v784_v11 = vpop.xlane.xlu0 %783 }
 0x24c   : > { %v814_v12 = vmul.f32 1.442695, %v800_v10  ;;  %v798_v13 = vsub.f32 %v734_v61, %v784_v11 }
 0x24e   : > { %1392 = vpow2.f32 %v814_v12  ;;  %v810_v14 = vmul.f32 1.442695, %v798_v13 }
 0x250   : > { %1394 = vpow2.f32 %v810_v14 }
 0x253   : > { %v775_v19 = vpop.xlane.xlu0 %774 }
 0x254   : > { %v1993_v15 = vpop.eup %1392  ;;  %v795_v43 = vsub.f32 %v1979_v57, %v775_v19  ;;  %v1026_v19 = vld [vmem:[#allocation12 + $0x78] sm:$0xff] }
 0x255   : > { %v836_v16 = vsel %vm769_vm2, %v1993_v15, 0.0  ;;  %1031 = vmatpush.msra.mxu3 %v1026_v19 }
 0x256   : > { %v1395_v17 = vpop.eup %1394  ;;  %837 = vadd.xlane.f32.xlu0 %v836_v16  ;;  %v804_v44 = vmul.f32 1.442695, %v795_v43 }
 0x257   : > { %v830_v18 = vsel %vm769_vm2, %v1395_v17, 0.0  ;;  %v778_v20 = vpop.xlane.xlu1 %777 }
 0x258   : > { %831 = vadd.xlane.f32.xlu1 %v830_v18  ;;  %v796_v21 = vsub.f32 %v705_v0, %v778_v20  ;;  %v1025_v20 = vld [vmem:[#allocation12 + $0x70] sm:$0xff] }
 0x259   : > { %1032 = vmatpush.msra.mxu3 %v1025_v20 }
 0x25a   : > { %v806_v22 = vmul.f32 1.442695, %v796_v21  ;;  %v787_v23 = vpop.xlane.xlu2 %786  ;;  %v1024_v21 = vld [vmem:[#allocation12 + $0x68] sm:$0xff] }
 0x25b   : > { %v799_v24 = vsub.f32 %v737_v2, %v787_v23  ;;  %1033 = vmatpush.msra.mxu3 %v1024_v21 }
 0x25c   : > { %1396 = vpow2.f32 %v806_v22  ;;  %v1023_v22 = vld [vmem:[#allocation12 + $0x60] sm:$0xff] }
 0x25d   : > { %v812_v25 = vmul.f32 1.442695, %v799_v24  ;;  %1034 = vmatpush.msra.mxu3 %v1023_v22  ;;  %v1022_v24 = vld [vmem:[#allocation12 + $0x58] sm:$0xff] }
 0x25f   : > { %1398 = vpow2.f32 %v812_v25  ;;  %v781_v26 = vpop.xlane.xlu0 %780  ;;  %v793_v27 = vpop.xlane.xlu1 %792  ;;  %v1021_v25 = vld [vmem:[#allocation12 + $0x50] sm:$0xff]  ;;  %1035 = vmatpush.msra.mxu3 %v1022_v24 }
 0x260   : > { %v797_v28 = vsub.f32 %v708_v5, %v781_v26  ;;  %v801_v31 = vsub.f32 %v766_v4, %v793_v27  ;;  %v1020_v26 = vld [vmem:[#allocation12 + $0x48] sm:$0xff]  ;;  %v1019_v27 = vld [vmem:[#allocation12 + $0x40] sm:$0xff] }
 0x261   : > { %1036 = vmatpush.msra.mxu3 %v1021_v25 }
 0x262   : > { %v1397_v29 = vpop.eup %1396  ;;  %v808_v30 = vmul.f32 1.442695, %v797_v28  ;;  %v816_v35 = vmul.f32 1.442695, %v801_v31  ;;  %v772_v40 = vpop.xlane.xlu2 %771  ;;  %v1018_v28 = vld [vmem:[#allocation12 + $0x38] sm:$0xff]  ;;  %v1015_v31 = vld [vmem:[#allocation12 + $0x20] sm:$0xff] }
 0x263   : > { %v824_v32 = vsel %vm769_vm2, %v1397_v29, 0.0  ;;  %v794_v41 = vsub.f32 %v1981_v58, %v772_v40  ;;  %1037 = vmatpush.msra.mxu3 %v1020_v26 }
 0x264   : > { %825 = vadd.xlane.f32.xlu2 %v824_v32  ;;  %1400 = vpow2.f32 %v808_v30  ;;  %v1016_v30 = vld [vmem:[#allocation12 + $0x28] sm:$0xff]  ;;  %v1014_v32 = vld [vmem:[#allocation12 + $0x18] sm:$0xff] }
 0x265   : > { %v1399_v33 = vpop.eup %1398  ;;  %1402 = vpow2.f32 %v816_v35  ;;  %v802_v42 = vmul.f32 1.442695, %v794_v41  ;;  %1038 = vmatpush.msra.mxu3 %v1019_v27  ;;  %v1011_v35 = vld [vmem:[#allocation12] sm:$0xff] }
 0x266   : > { %v833_v34 = vsel %vm769_vm2, %v1399_v33, 0.0 }
 0x267   : > { %834 = vadd.xlane.f32.xlu1 %v833_v34  ;;  %1404 = vpow2.f32 %v802_v42  ;;  %1039 = vmatpush.msra.mxu3 %v1018_v28  ;;  %v1012_v34 = vld [vmem:[#allocation12 + $0x8] sm:$0xff] }
 0x268   : > { %1406 = vpow2.f32 %v804_v44  ;;  %v1391_v44 = vld [vmem:[%s2081_s9] ss:$0 sm:$0xff] }
 0x26a   : > { %v1401_v36 = vpop.eup %1400 }
 0x26b   : > { %v827_v37 = vsel %vm769_vm2, %v1401_v36, 0.0  ;;  %v1403_v38 = vpop.eup %1402 }
 0x26c   : > { %828 = vadd.xlane.f32.xlu0 %v827_v37  ;;  %v839_v39 = vsel %vm769_vm2, %v1403_v38, 0.0 }
 0x26d   : > { %v1405_v45 = vpop.eup %1404 }
 0x26e   : > { %v818_v46 = vsel %vm769_vm2, %v1405_v45, 0.0  ;;  %v1407_v47 = vpop.eup %1406 }
 0x26f   : > { %v821_v48 = vsel %vm769_vm2, %v1407_v47, 0.0 }
 0x274   : > { %840 = vadd.xlane.f32.xlu0 %v839_v39 }
 0x27c   : > { %646 = vrot.lane.b32.xlu2 %v1967_v50, %s1712_s24 }
 0x280   : > { %643 = vrot.lane.b32.xlu1 %v1967_v50, %s1711_s30 }
 0x288   : > { %649 = vrot.lane.b32.xlu0 %v1967_v50, %s1710_s29 }
 0x2a5   : > { %819 = vadd.xlane.f32.xlu2 %v818_v46 }
 0x2aa   : > { %822 = vadd.xlane.f32.xlu1 %v821_v48 }
 0x2c9   : > { %v838_v55 = vpop.xlane.xlu0 %837 }
 0x2cb   : > { %v832_v49 = vpop.xlane.xlu1 %831 }
 0x2cc   : > { %1408 = vrcp.f32 %v832_v49 }
 0x2d2   : > { %v1409_v52 = vpop.eup %1408 }
 0x2d3   : > { %v854_v53 = vmul.f32 %v1409_v52, %v1395_v17 }
 0x2d7   : > { %v826_v50 = vpop.xlane.xlu2 %825 }
 0x2da   : > { %v835_v51 = vpop.xlane.xlu1 %834 }
 0x2db   : > { %1410 = vrcp.f32 %v835_v51 }
 0x2dc   : > { %1412 = vrcp.f32 %v826_v50 }
 0x2df   : > { %v647_v54 = vpop.permute.xlu2 %646  ;;  %v829_v58 = vpop.xlane.xlu0 %828 }
 0x2e0   : > { %937 = vmatpush.msrb.mxu2 %v647_v54  ;;  %1414 = vrcp.f32 %v829_v58 }
 0x2e1   : > { %1261 = vmatmul.msk.f32.vlgmr.msrb.gmra.mxu2 %vm769_vm2, %v854_v53  ;;  %v1411_v56 = vpop.eup %1410  ;;  %1416 = vrcp.f32 %v838_v55 }
 0x2e2   : > { %v855_v57 = vmul.f32 %v1411_v56, %v1399_v33  ;;  %v1413_v59 = vpop.eup %1412  ;;  %v1013_v33 = vld [vmem:[#allocation12 + $0x10] sm:$0xff] }
 0x2e3   : > { %v852_v60 = vmul.f32 %v1413_v59, %v1397_v29  ;;  %v1017_v29 = vld [vmem:[#allocation12 + $0x30] sm:$0xff] }
 0x2e4   : > { %1040 = vmatpush.msra.mxu3 %v1017_v29 }
 0x2e6   : > { %v1415_v63 = vpop.eup %1414  ;;  %1041 = vmatpush.msra.mxu3 %v1016_v30 }
 0x2e7   : > { %v841_v62 = vpop.xlane.xlu0 %840  ;;  %v1417_v0 = vpop.eup %1416  ;;  %v853_v1 = vmul.f32 %v1415_v63, %v1401_v36 }
 0x2e8   : > { %1418 = vrcp.f32 %v841_v62  ;;  %v856_v3 = vmul.f32 %v1417_v0, %v1993_v15  ;;  %1042 = vmatpush.msra.mxu3 %v1015_v31 }
 0x2e9   : > { %1262 = vmatmul.msk.f32.gmra.mxu2 %vm769_vm2, %v855_v57 }
 0x2ea   : > { %1043 = vmatpush.msra.mxu3 %v1014_v32 }
 0x2ec   : > { %1044 = vmatpush.msra.mxu3 %v1013_v33 }
 0x2ee   : > { %v1419_v4 = vpop.eup %1418  ;;  %1045 = vmatpush.msra.mxu3 %v1012_v34 }
 0x2ef   : > { %v857_v5 = vmul.f32 %v1419_v4, %v1403_v38 }
 0x2f0   : > { %1046 = vmatpush.msra.mxu3 %v1011_v35 }
 0x2f2   : > { %v644_v61 = vpop.permute.xlu1 %643 }
 0x2f3   : > { %908 = vmatpush.msrb.mxu1 %v644_v61 }
 0x2f4   : > { %1259 = vmatmul.msk.f32.vlgmr.msrb.gmra.mxu1 %vm769_vm2, %v852_v60 }
 0x2fa   : > { %v650_v2 = vpop.permute.xlu0 %649 }
 0x2fb   : > { %966 = vmatpush.msrb.mxu0 %v650_v2 }
 0x2fc   : > { %1260 = vmatmul.msk.f32.gmra.mxu1 %vm769_vm2, %v853_v1  ;;  %1263 = vmatmul.msk.f32.vlgmr.msrb.gmra.mxu0 %vm769_vm2, %v856_v3 }
 0x304   : > { %1264 = vmatmul.msk.f32.gmra.mxu0 %vm769_vm2, %v857_v5 }
 0x318   : > { %v820_v6 = vpop.xlane.xlu2 %819 }
 0x319   : > { %1420 = vrcp.f32 %v820_v6 }
 0x31d   : > { %v823_v7 = vpop.xlane.xlu1 %822 }
 0x31e   : > { %1422 = vrcp.f32 %v823_v7 }
 0x31f   : > { %v1421_v8 = vpop.eup %1420 }
 0x320   : > { %v850_v9 = vmul.f32 %v1421_v8, %v1405_v45 }
 0x322   : > { %1257 = vmatmul.msk.f32.vlgmr.msrb.gmra.mxu3 %vm769_vm2, %v850_v9 }
 0x324   : > { %v1423_v10 = vpop.eup %1422 }
 0x325   : > { %v851_v11 = vmul.f32 %v1423_v10, %v1407_v47 }
 0x32a   : > { %1258 = vmatmul.msk.f32.gmra.mxu3 %vm769_vm2, %v851_v11 }
 0x364   : > { %v939_v12 = vpop.f32.mrf.mxu2 }
 0x36c   : > { %v942_v13 = vpop.f32.mrf.mxu2 }
 0x36d   : > { %991 = vrot.lane.b32.xlu2 %v942_v13, %s1712_s24 }
 0x371   : > { %v910_v14 = vpop.f32.mrf.mxu1 }
 0x372   : > { %978 = vrot.lane.b32.xlu0 %v910_v14, %s1710_s29 }
 0x379   : > { %v968_v15 = vpop.f32.mrf.mxu0  ;;  %v913_v17 = vpop.f32.mrf.mxu1 }
 0x37a   : > { %989 = vrot.lane.b32.xlu0 %v939_v12, %s1712_s24 }
 0x381   : > { %v971_v16 = vpop.f32.mrf.mxu0 }
 0x382   : > { %1000 = vrot.lane.b32.xlu0 %v968_v15, %s1711_s30  ;;  %1002 = vrot.lane.b32.xlu1 %v971_v16, %s1711_s30  ;;  %s1618_s30 = sshra.s32 %s1074_s21, 4  ;;  %s1619_s30 = int_to_ptr.hbm [resolvable:$true] %s1618_s30 }
 0x383   : > { %s1620_s24 = scalar_lea.hbm %s1619_s30, 16  ;;  %p1625_p10 = scmp.lt.s32.totalorder %s1619_s30, %s2117_s26 }
 0x384   : > { %p1621_p1 = scmp.ne.s32.totalorder %s1619_s30, %s1620_s24  ;;  %p1626_p12 = scmp.lt.s32.totalorder %s1624_s22, %s1620_s24 }
 0x386   : > { %p1622_p4 = pnand %p1621_p1, %p1879_p7  ;;  %p1627_p13 = por %p1626_p12, %p1625_p10 }
 0x388   : > { %p1623_p8 = pneg %p1622_p4 }
 0x38a   : > { %980 = vrot.lane.b32.xlu0 %v913_v17, %s1710_s29  ;;  %s1057_s29 = scalar_lea.sflag [#allocation5], %s1908_s28  ;;  %p1628_p0 = pnand %p1627_p13, %p1623_p8 }
 0x3a5   : > { %v881_v18 = vpop.f32.mrf.mxu3 }
 0x3a6   : > { %974 = vst.msk [vmem:[#allocation2] sm:$0xff] %vm652_vm1, %v881_v18 }
 0x3ad   : > { %v884_v23 = vpop.f32.mrf.mxu3 }
 0x3ae   : > { %975 = vst.msk [vmem:[#allocation2 + $0x8] sm:$0xff] %vm652_vm1, %v884_v23 }
 0x3c7   : > { %v992_v41 = vpop.permute.xlu2 %991 }
 0x3e4   : > { %v979_v36 = vpop.permute.xlu0 %978 }
 0x3e5   : > { %985 = vst.msk [vmem:[#allocation2] sm:$0xff] %vm984_vm3, %v979_v36 }
 0x3ec   : > { %v990_v37 = vpop.permute.xlu0 %989 }
 0x3ed   : > { %996 = vst.msk [vmem:[#allocation2] sm:$0xff] %vm995_vm4, %v990_v37 }
 0x3f4   : > { %v1001_v38 = vpop.permute.xlu0 %1000  ;;  %v1003_v42 = vpop.permute.xlu1 %1002 }
 0x3f5   : > { %1007 = vst.msk [vmem:[#allocation2] sm:$0xff] %vm1006_vm5, %v1001_v38 }
 0x3fc   : > { %v981_v39 = vpop.permute.xlu0 %980  ;;  %v1009_v40 = vld [vmem:[#allocation2] sm:$0xff] }
 0x3fd   : > { %986 = vst.msk [vmem:[#allocation2 + $0x8] sm:$0xff] %vm984_vm3, %v981_v39  ;;  %1047 = vmatmul.f32.vlgmr.msra.gmra.mxu3 %v1009_v40 }
 0x3fe   : > { %997 = vst.msk [vmem:[#allocation2 + $0x8] sm:$0xff] %vm995_vm4, %v992_v41 }
 0x3ff   : > { %1008 = vst.msk [vmem:[#allocation2 + $0x8] sm:$0xff] %vm1006_vm5, %v1003_v42 }
 0x406   : > { %v1010_v43 = vld [vmem:[#allocation2 + $0x8] sm:$0xff] }
 0x407   : > { %1050 = vmatmul.f32.gmra.mxu3 %v1010_v43 }
 0x480   : > { %v1048_v45 = vpop.f32.mrf.mxu3 }
 0x481   : > { %v1049_v46 = vadd.f32 %v1391_v44, %v1048_v45 }
 0x483   : > { %1054 = vst [vmem:[%s502_s10] sm:$0xff] %v1049_v46 }
 0x48a   : > { %v1051_v47 = vpop.f32.mrf.mxu3 }
 0x48b   : > { %v1052_v48 = vadd.f32 %v1391_v44, %v1051_v47 }
 0x48d   : > { %1055 = vst [vmem:[%s502_s10 + $0x8] sm:$0xff] %v1052_v48 }
 0x48e   : > { %1631 = shalt.err (!%p1628_p0)
}
 0x48f   : > { %s1713_s28 = smov 128   ;;  %s1714_s2 = smov 8  }
 0x490   : > { %1293 = dma.vmem_to_hbm [thread:$0]  (%p1879_p7), %s1072_s19, 256, %s1074_s21, %s1057_s29, %s1713_s28, %s1713_s28, %s1714_s2  }
 0x491 PF: > { %s2118_s11 = sld [smem:[#allocation21_spill]]  ;;  %p1316_p3 = pnand %p1229_p11, %p1815_p6 }
 0x493   : > { %p1317_p5 = pneg %p1316_p3 }
 0x497   : > { %s1088_s4 = sand.u32 1, %s2118_s11  }
 0x498   : > { %s1089_s10 = scalar_lea.sflag [#allocation5], %s1088_s4 }
 0x499   : > { %1677 = dma.done.wait (%p1317_p5), %s1089_s10, 256  }
 0x49a   : > { %1679 = vsyncadd (%p1317_p5), %s1089_s10, 4294967040  ;;  %s31_s18 = sadd.s32 1, %s1702_s18   ;;  %s2120_s23 = sld [smem:[#allocation22_spill]] }
 0x49b   : > { %p28_p9 = scmp.ge.s32.totalorder %s31_s18, 4   ;;  %s2121_s15 = sld [smem:[#allocation26_spill]] }
 0x49c   : > { %s2122_s8 = sld [smem:[#allocation24_spill]]  ;;  %s2123_s13 = smov %s1686_s14 }
 0x49d   : > { %s2125_s16 = smov %s1698_s17 }
 0x49e   :  { %30 = sbr.rel (!%p28_p9) target bundleno = 16 (0x10), region = 134 }
 0x4a0   : > { %s2124_s14 = smov %s2120_s23 }
 0x4a2   : > { %s2126_s17 = smov %s2122_s8 }
 0x4a3   :  { %1095 = vsyncpa [#allocation4], 1 }
 0x4a4   :  { %1097 = vsyncpa [#allocation4 + $0x1], 1 }
 0x4a5   :  { %1098 = vsyncpa [#allocation7], 1 }
 0x4a6   :  { %1100 = vsyncpa [#allocation7 + $0x1], 1 }
 0x4a7   :  { %1101 = vsyncpa [#allocation10], 1 }
 0x4a8   :  { %1102 = vsyncpa [#allocation13], 1 }
 0x4a9   :  { %1103 = vsyncpa [#allocation5], 1 }
 0x4aa   :  { %1105 = vsyncpa [#allocation5 + $0x1], 1 }

</bundles_post_ra>
